<compile_context>
chip_gen: v7x
topology: tpu7x:2x2x1
jax: 0.10.0
libtpu: 0.0.40
codegen_flags: <defaults>
</compile_context>

<pallas_src>
import math
import functools

import jax
import jax.numpy as jnp
from jax import lax
from jax.experimental import pallas as pl
from jax.experimental.pallas import tpu as pltpu


_SQRT_HALF = 0.7071067811865476       # 1/sqrt(2)
_GELU_C = 0.7978845608028654          # sqrt(2/pi)


def _gelu_erf(x):
    # PyTorch nn.GELU() default = exact erf formulation (long VPU polynomial).
    return 0.5 * x * (1.0 + lax.erf(x * _SQRT_HALF))


def _gelu_tanh(x):
    # tanh approximation -> transcendental goes to the EUP (separate bundle slot).
    return 0.5 * x * (1.0 + jnp.tanh(_GELU_C * (x + 0.044715 * x * x * x)))


def _mlp_kernel(x_ref, w0t_ref, wht_ref, b_ref, o_ref, *,
                num_hidden, approx_gelu, compute_dtype):
    """Transposed MLP: activations kept as (Hp, tile_m), batch along lanes.

    x_ref  : (tile_m, F)      input tile (original (B, F) layout, no HBM transpose)
    w0t_ref: (Hp, F)          W0^T
    wht_ref: (L, Hp, Hp)      hidden W^T stack
    b_ref  : (L+3, Hp, 1)     [b0, bh_0..bh_{L-1}, wo column, bo (row 0)]  (f32)
    o_ref  : (1, tile_m)      sigmoid(logits), lane-dense
    """
    gelu = _gelu_tanh if approx_gelu else _gelu_erf

    # initial layer: contract along F of both operands -> (Hp, tile_m).
    # The tiny input-tile transpose is handled inside the MXU/XLU path, not as
    # a separate wrapper-side HBM pass.  f32 accumulation always.
    x = x_ref[...].astype(compute_dtype)
    h = lax.dot_general(w0t_ref[...], x,
                        dimension_numbers=(((1,), (1,)), ((), ())),
                        preferred_element_type=jnp.float32)
    h = gelu(h + b_ref[0])                       # (Hp,1) bias broadcast over lanes

    # hidden FeedForward layers (unrolled; num_hidden is a static Python int)
    for l in range(num_hidden):
        h = jnp.dot(wht_ref[l], h.astype(compute_dtype),
                    preferred_element_type=jnp.float32)
        h = gelu(h + b_ref[1 + l])

    # output layer Linear(H, 1) -> Sigmoid as VPU mul + sublane (XLU) reduce:
    # keeps the store lane-dense and stays off the (badly underfilled) MXU.
    wo_col = b_ref[num_hidden + 1]               # (Hp, 1)
    bo = b_ref[num_hidden + 2][0:1, :]           # (1, 1)
    logit = jnp.sum(h * wo_col, axis=0, keepdims=True) + bo   # (1, tile_m)
    o_ref[...] = jax.nn.sigmoid(logit).astype(o_ref.dtype)


def _tensorcore_count():
    """TensorCores per chip (v7x has 2; v5e/v6e have 1).  Defensive detection."""
    n = None
    try:
        info = pltpu.get_tpu_info()
        for name in ("num_cores", "core_count", "num_tensorcores", "tensorcore_count"):
            v = getattr(info, name, None)
            if isinstance(v, int) and v > 0:
                n = v
                break
    except Exception:
        n = None
    if n is None:
        try:
            dev = jax.devices()[0]
            v = getattr(dev, "num_cores", None)
            if isinstance(v, int) and v > 0:
                n = v
            elif "v7" in dev.device_kind.lower():
                n = 2
        except Exception:
            n = None
    if n is None:
        n = 1
    return max(1, min(2, n))


def _choose_tile_m(batch, feat, n_cores):
    """Lane-tile size: a multiple of 128 dividing batch, VMEM-safe, and giving
    enough grid steps (>=4 total, >=2 per TensorCore) to overlap the x-tile DMA
    and output store with compute.  Never below 512 lanes unless forced."""
    if batch % 128 != 0:
        return batch                              # single full-array block
    # VMEM cap: double-buffered (tile_m, F) f32 input tile within ~8 MiB.
    cap = ((8 << 20) // max(1, 2 * feat * 4)) // 128 * 128
    cap = max(128, min(2048, cap))
    cands = [t for t in range(128, batch + 1, 128) if batch % t == 0 and t <= cap]
    if not cands:
        cands = [128]
    min_steps = max(4, 2 * n_cores)
    good = [t for t in cands if batch // t >= min_steps and t >= 512]
    if good:
        return max(good)
    # Batch too small for full pipelining: at least feed every TensorCore.
    if n_cores > 1:
        core_ok = [t for t in cands if (batch // t) % n_cores == 0]
        if core_ok:
            return max(core_ok)
    return max(cands)


def _pack_params(params, hp, compute_dtype):
    """Transpose + pad weights, pack all biases / output weights into one slab."""
    w0, b0 = params["w0"], params["b0"]          # (F,H), (1,H)
    wh, bh = params["wh"], params["bh"]          # (L,H,H), (L,1,H)
    wo, bo = params["wo"], params["bo"]          # (H,1), (1,1)
    H = w0.shape[1]
    L = wh.shape[0]
    ph = hp - H

    w0_t = jnp.pad(w0.T, ((0, ph), (0, 0))).astype(compute_dtype)        # (Hp, F)
    wh_t = jnp.pad(jnp.transpose(wh, (0, 2, 1)),
                   ((0, 0), (0, ph), (0, ph))).astype(compute_dtype)     # (L, Hp, Hp)

    def col(v):                                  # -> (Hp, 1) zero-padded column
        v = v.reshape(-1, 1)
        return jnp.pad(v, ((0, hp - v.shape[0]), (0, 0)))

    cols = [col(b0)] + [col(bh[l]) for l in range(L)] + [col(wo)]
    cols.append(jnp.pad(bo.reshape(1, 1), ((0, hp - 1), (0, 0))))        # bo at row 0
    b_all = jnp.stack(cols, axis=0).astype(jnp.float32)                  # (L+3, Hp, 1)
    return w0_t, wh_t, b_all


def airline_weather_categorical_forward(x, params, *, tile_m=None,
                                         approximate_gelu=True,
                                         compute_dtype=jnp.bfloat16):
    """x: (B, F) float32.  params: dict from init_params.  Returns (B, 1).

    Defaults = fast path (tanh-GELU on EUP, bf16 matmul operands, f32 accum).
    Pass approximate_gelu=False, compute_dtype=jnp.float32 for exact PyTorch parity.
    """
    B, F = x.shape
    H = params["w0"].shape[1]
    L = params["wh"].shape[0]
    assert L >= 1, "num_hidden must be >= 1"

    hp = ((H + 7) // 8) * 8                      # sublane-align hidden dim (zero pad, exact)
    w0_t, wh_t, b_all = _pack_params(params, hp, compute_dtype)

    if tile_m is None:
        tile_m = _choose_tile_m(B, F, _tensorcore_count())
    assert B % tile_m == 0, "batch must be a multiple of tile_m"
    num_tiles = B // tile_m

    kernel = functools.partial(_mlp_kernel, num_hidden=L,
                               approx_gelu=approximate_gelu,
                               compute_dtype=compute_dtype)

    out = pl.pallas_call(
        kernel,
        out_shape=jax.ShapeDtypeStruct((num_tiles, 1, tile_m), jnp.float32),
        grid_spec=pltpu.PrefetchScalarGridSpec(
            num_scalar_prefetch=0,
            grid=(num_tiles,),
            in_specs=[
                pl.BlockSpec((tile_m, F), lambda i: (i, 0)),           # x tile (no transpose)
                pl.BlockSpec((hp, F), lambda i: (0, 0)),               # W0^T (resident)
                pl.BlockSpec((L, hp, hp), lambda i: (0, 0, 0)),        # hidden W^T stack
                pl.BlockSpec((L + 3, hp, 1), lambda i: (0, 0, 0)),     # biases + wo + bo
            ],
            out_specs=pl.BlockSpec((None, 1, tile_m), lambda i: (i, 0, 0)),
        ),
        compiler_params=pltpu.CompilerParams(
            dimension_semantics=("parallel",)),
    )(x, w0_t, wh_t, b_all)

    return out.reshape(B, 1)


def init_params(key, input_features, hidden_features, num_hidden):
    """Deterministic PyTorch-style init: U(-1/sqrt(fan_in), 1/sqrt(fan_in))."""
    def linear(k, fan_in, fan_out):
        kw, kb = jax.random.split(k)
        bound = 1.0 / math.sqrt(fan_in)
        w = jax.random.uniform(kw, (fan_in, fan_out), jnp.float32, -bound, bound)
        b = jax.random.uniform(kb, (1, fan_out), jnp.float32, -bound, bound)
        return w, b

    keys = jax.random.split(key, num_hidden + 2)
    w0, b0 = linear(keys[0], input_features, hidden_features)
    wh_list, bh_list = [], []
    for l in range(num_hidden):
        w, b = linear(keys[1 + l], hidden_features, hidden_features)
        wh_list.append(w)
        bh_list.append(b)
    wo, bo = linear(keys[-1], hidden_features, 1)
    return {
        "w0": w0, "b0": b0,
        "wh": jnp.stack(wh_list, axis=0),                               # (L, H, H)
        "bh": jnp.stack(bh_list, axis=0).reshape(num_hidden, 1, hidden_features),
        "wo": wo, "bo": bo,
    }


def _reference_forward(x, params, approximate_gelu=False):
    gelu = _gelu_tanh if approximate_gelu else _gelu_erf
    h = gelu(x @ params["w0"] + params["b0"])
    for l in range(params["wh"].shape[0]):
        h = gelu(h @ params["wh"][l] + params["bh"][l])
    return jax.nn.sigmoid(h @ params["wo"] + params["bo"])


if __name__ == "__main__":
    # Small shapes consistent with the module: batch=256, input_features=32,
    # hidden_features=64, num_hidden=2.
    B, F, H, NUM_HIDDEN = 256, 32, 64, 2

    key = jax.random.PRNGKey(0)
    kx, kp = jax.random.split(key)
    x = jax.random.normal(kx, (B, F), dtype=jnp.float32)
    params = init_params(kp, F, H, NUM_HIDDEN)

    ref = _reference_forward(x, params)

    # Exact path (fp32 matmuls, erf-GELU) — parity with the PyTorch module.
    out_exact = airline_weather_categorical_forward(
        x, params, approximate_gelu=False, compute_dtype=jnp.float32)
    out_exact = jax.block_until_ready(out_exact)
    assert out_exact.shape == (B, 1)
    assert jnp.allclose(out_exact, ref, atol=2e-5, rtol=2e-5), "exact path mismatch"

    # Default fast path (tanh-GELU on the EUP, bf16 operands, fp32 accumulation).
    out_fast = airline_weather_categorical_forward(x, params)
    out_fast = jax.block_until_ready(out_fast)
    assert out_fast.shape == (B, 1)
    assert jnp.allclose(out_fast, ref, atol=5e-2), "fast path deviates too much"

    # Multi-tile grid (pipelined path): larger batch, forced 4 grid steps,
    # exact numerics to also verify the tile -> (B, 1) ordering.
    B2 = 1024
    x2 = jax.random.normal(jax.random.PRNGKey(1), (B2, F), dtype=jnp.float32)
    ref2 = _reference_forward(x2, params)
    out2 = airline_weather_categorical_forward(
        x2, params, tile_m=256, approximate_gelu=False, compute_dtype=jnp.float32)
    out2 = jax.block_until_ready(out2)
    assert out2.shape == (B2, 1)
    assert jnp.allclose(out2, ref2, atol=2e-5, rtol=2e-5), "multi-tile mismatch"

    print("KERNEL_OK")
</pallas_src>

<mosaic_0001>
module attributes {stable_mosaic.version = 11 : i64} {
  func.func @_mlp_kernel(%arg0: i32, %arg1: memref<256x32xf32, #tpu.memory_space<vmem>>, %arg2: memref<64x32xf32, #tpu.memory_space<vmem>>, %arg3: memref<2x64x64xf32, #tpu.memory_space<vmem>>, %arg4: memref<5x64x1xf32, #tpu.memory_space<vmem>>, %arg5: memref<1x1x256xf32, #tpu.memory_space<vmem>>) attributes {dimension_semantics = [#tpu.dimension_semantics<parallel>], iteration_bounds = array<i64: 1>, scalar_prefetch = 0 : i64, scratch_operands = 0 : i64, tpu.core_type = #tpu.core_type<tc>, window_params = [{transform_indices = @transform_0, window_bounds = array<i64: 256, 32>}, {pipeline_mode = #tpu.pipeline_mode<synchronous>, transform_indices = @transform_1, window_bounds = array<i64: 64, 32>}, {pipeline_mode = #tpu.pipeline_mode<synchronous>, transform_indices = @transform_2, window_bounds = array<i64: 2, 64, 64>}, {pipeline_mode = #tpu.pipeline_mode<synchronous>, transform_indices = @transform_3, window_bounds = array<i64: 5, 64, 1>}, {transform_indices = @transform_4, window_bounds = array<i64: 1, 1, 256>}]} {
    %c0 = arith.constant 0 : index
    %c0_0 = arith.constant 0 : index
    %0 = vector.load %arg1[%c0, %c0_0] : memref<256x32xf32, #tpu.memory_space<vmem>>, vector<256x32xf32>
    %c0_1 = arith.constant 0 : index
    %c0_2 = arith.constant 0 : index
    %1 = vector.load %arg2[%c0_1, %c0_2] : memref<64x32xf32, #tpu.memory_space<vmem>>, vector<64x32xf32>
    %cst = arith.constant dense<0.000000e+00> : vector<64x256xf32>
    %2 = tpu.matmul %1, %0, %cst {dimension_numbers = #tpu.dot_dimension_numbers<[1], [1], [0], [0], [0, 0, 1, 0], [], []>} : vector<64x32xf32>, vector<256x32xf32>, vector<64x256xf32> -> vector<64x256xf32>
    %c0_3 = arith.constant 0 : index
    %c0_4 = arith.constant 0 : index
    %c0_5 = arith.constant 0 : index
    %3 = vector.load %arg4[%c0_3, %c0_4, %c0_5] : memref<5x64x1xf32, #tpu.memory_space<vmem>>, vector<1x64x1xf32>
    %4 = vector.shape_cast %3 : vector<1x64x1xf32> to vector<64x1xf32>
    %5 = vector.broadcast %4 : vector<64x1xf32> to vector<64x256xf32>
    %6 = arith.addf %2, %5 : vector<64x256xf32>
    %cst_6 = arith.constant 5.000000e-01 : f32
    %7 = vector.broadcast %cst_6 : f32 to vector<64x256xf32>
    %8 = arith.mulf %7, %6 : vector<64x256xf32>
    %cst_7 = arith.constant 0.707106769 : f32
    %9 = vector.broadcast %cst_7 : f32 to vector<64x256xf32>
    %10 = arith.mulf %6, %9 : vector<64x256xf32>
    %11 = math.erf %10 : vector<64x256xf32>
    %cst_8 = arith.constant 1.000000e+00 : f32
    %12 = vector.broadcast %cst_8 : f32 to vector<64x256xf32>
    %13 = arith.addf %12, %11 : vector<64x256xf32>
    %14 = arith.mulf %8, %13 : vector<64x256xf32>
    %c0_9 = arith.constant 0 : index
    %c0_10 = arith.constant 0 : index
    %c0_11 = arith.constant 0 : index
    %15 = vector.load %arg3[%c0_9, %c0_10, %c0_11] : memref<2x64x64xf32, #tpu.memory_space<vmem>>, vector<1x64x64xf32>
    %16 = vector.shape_cast %15 : vector<1x64x64xf32> to vector<64x64xf32>
    %cst_12 = arith.constant dense<0.000000e+00> : vector<64x256xf32>
    %17 = tpu.matmul %16, %14, %cst_12 {dimension_numbers = #tpu.dot_dimension_numbers<[1], [0], [0], [1], [0, 0, 1, 1], [], []>} : vector<64x64xf32>, vector<64x256xf32>, vector<64x256xf32> -> vector<64x256xf32>
    %c1 = arith.constant 1 : index
    %c0_13 = arith.constant 0 : index
    %c0_14 = arith.constant 0 : index
    %18 = vector.load %arg4[%c1, %c0_13, %c0_14] : memref<5x64x1xf32, #tpu.memory_space<vmem>>, vector<1x64x1xf32>
    %19 = vector.shape_cast %18 : vector<1x64x1xf32> to vector<64x1xf32>
    %20 = vector.broadcast %19 : vector<64x1xf32> to vector<64x256xf32>
    %21 = arith.addf %17, %20 : vector<64x256xf32>
    %cst_15 = arith.constant 5.000000e-01 : f32
    %22 = vector.broadcast %cst_15 : f32 to vector<64x256xf32>
    %23 = arith.mulf %22, %21 : vector<64x256xf32>
    %cst_16 = arith.constant 0.707106769 : f32
    %24 = vector.broadcast %cst_16 : f32 to vector<64x256xf32>
    %25 = arith.mulf %21, %24 : vector<64x256xf32>
    %26 = math.erf %25 : vector<64x256xf32>
    %cst_17 = arith.constant 1.000000e+00 : f32
    %27 = vector.broadcast %cst_17 : f32 to vector<64x256xf32>
    %28 = arith.addf %27, %26 : vector<64x256xf32>
    %29 = arith.mulf %23, %28 : vector<64x256xf32>
    %c1_18 = arith.constant 1 : index
    %c0_19 = arith.constant 0 : index
    %c0_20 = arith.constant 0 : index
    %30 = vector.load %arg3[%c1_18, %c0_19, %c0_20] : memref<2x64x64xf32, #tpu.memory_space<vmem>>, vector<1x64x64xf32>
    %31 = vector.shape_cast %30 : vector<1x64x64xf32> to vector<64x64xf32>
    %cst_21 = arith.constant dense<0.000000e+00> : vector<64x256xf32>
    %32 = tpu.matmul %31, %29, %cst_21 {dimension_numbers = #tpu.dot_dimension_numbers<[1], [0], [0], [1], [0, 0, 1, 1], [], []>} : vector<64x64xf32>, vector<64x256xf32>, vector<64x256xf32> -> vector<64x256xf32>
    %c2 = arith.constant 2 : index
    %c0_22 = arith.constant 0 : index
    %c0_23 = arith.constant 0 : index
    %33 = vector.load %arg4[%c2, %c0_22, %c0_23] : memref<5x64x1xf32, #tpu.memory_space<vmem>>, vector<1x64x1xf32>
    %34 = vector.shape_cast %33 : vector<1x64x1xf32> to vector<64x1xf32>
    %35 = vector.broadcast %34 : vector<64x1xf32> to vector<64x256xf32>
    %36 = arith.addf %32, %35 : vector<64x256xf32>
    %cst_24 = arith.constant 5.000000e-01 : f32
    %37 = vector.broadcast %cst_24 : f32 to vector<64x256xf32>
    %38 = arith.mulf %37, %36 : vector<64x256xf32>
    %cst_25 = arith.constant 0.707106769 : f32
    %39 = vector.broadcast %cst_25 : f32 to vector<64x256xf32>
    %40 = arith.mulf %36, %39 : vector<64x256xf32>
    %41 = math.erf %40 : vector<64x256xf32>
    %cst_26 = arith.constant 1.000000e+00 : f32
    %42 = vector.broadcast %cst_26 : f32 to vector<64x256xf32>
    %43 = arith.addf %42, %41 : vector<64x256xf32>
    %44 = arith.mulf %38, %43 : vector<64x256xf32>
    %c3 = arith.constant 3 : index
    %c0_27 = arith.constant 0 : index
    %c0_28 = arith.constant 0 : index
    %45 = vector.load %arg4[%c3, %c0_27, %c0_28] : memref<5x64x1xf32, #tpu.memory_space<vmem>>, vector<1x64x1xf32>
    %46 = vector.shape_cast %45 : vector<1x64x1xf32> to vector<64x1xf32>
    %c4 = arith.constant 4 : index
    %c0_29 = arith.constant 0 : index
    %c0_30 = arith.constant 0 : index
    %47 = vector.load %arg4[%c4, %c0_29, %c0_30] : memref<5x64x1xf32, #tpu.memory_space<vmem>>, vector<1x64x1xf32>
    %48 = vector.shape_cast %47 : vector<1x64x1xf32> to vector<64x1xf32>
    %49 = vector.extract_strided_slice %48 {offsets = [0, 0], sizes = [1, 1], strides = [1, 1]} : vector<64x1xf32> to vector<1x1xf32>
    %50 = vector.broadcast %46 : vector<64x1xf32> to vector<64x256xf32>
    %51 = arith.mulf %44, %50 : vector<64x256xf32>
    %cst_31 = arith.constant dense<0.000000e+00> : vector<256xf32>
    %52 = vector.multi_reduction <add>, %51, %cst_31 [0] : vector<64x256xf32> to vector<256xf32>
    %53 = vector.shape_cast %52 : vector<256xf32> to vector<1x256xf32>
    %54 = vector.broadcast %49 : vector<1x1xf32> to vector<1x256xf32>
    %55 = arith.addf %53, %54 : vector<1x256xf32>
    %56 = arith.negf %55 : vector<1x256xf32>
    %57 = math.exp %56 : vector<1x256xf32>
    %cst_32 = arith.constant 1.000000e+00 : f32
    %58 = vector.broadcast %cst_32 : f32 to vector<1x256xf32>
    %59 = arith.addf %58, %57 : vector<1x256xf32>
    %60 = arith.divf %58, %59 : vector<1x256xf32>
    %c0_33 = arith.constant 0 : index
    %c0_34 = arith.constant 0 : index
    %c0_35 = arith.constant 0 : index
    %61 = vector.load %arg5[%c0_33, %c0_34, %c0_35] : memref<1x1x256xf32, #tpu.memory_space<vmem>>, vector<1x1x256xf32>
    %62 = vector.shape_cast %61 : vector<1x1x256xf32> to vector<1x256xf32>
    %63 = vector.shape_cast %60 : vector<1x256xf32> to vector<1x1x256xf32>
    tpu.vector_store %arg5[%c0_33, %c0_34, %c0_35], %63 {strides = array<i32>} : memref<1x1x256xf32, #tpu.memory_space<vmem>>, vector<1x1x256xf32>,
    return
  }
  func.func @transform_0(%arg0: i32) -> (i32, i32) {
    %c0_i32 = arith.constant 0 : i32
    %c0_i32_0 = arith.constant 0 : i32
    return %arg0, %c0_i32 : i32, i32
  }
  func.func @transform_1(%arg0: i32) -> (i32, i32) {
    %c0_i32 = arith.constant 0 : i32
    %c0_i32_0 = arith.constant 0 : i32
    %c0_i32_1 = arith.constant 0 : i32
    return %c0_i32, %c0_i32_0 : i32, i32
  }
  func.func @transform_2(%arg0: i32) -> (i32, i32, i32) {
    %c0_i32 = arith.constant 0 : i32
    %c0_i32_0 = arith.constant 0 : i32
    %c0_i32_1 = arith.constant 0 : i32
    %c0_i32_2 = arith.constant 0 : i32
    return %c0_i32, %c0_i32_0, %c0_i32_1 : i32, i32, i32
  }
  func.func @transform_3(%arg0: i32) -> (i32, i32, i32) {
    %c0_i32 = arith.constant 0 : i32
    %c0_i32_0 = arith.constant 0 : i32
    %c0_i32_1 = arith.constant 0 : i32
    %c0_i32_2 = arith.constant 0 : i32
    return %c0_i32, %c0_i32_0, %c0_i32_1 : i32, i32, i32
  }
  func.func @transform_4(%arg0: i32) -> (i32, i32, i32) {
    %c0_i32 = arith.constant 0 : i32
    %c0_i32_0 = arith.constant 0 : i32
    %c0_i32_1 = arith.constant 0 : i32
    return %arg0, %c0_i32, %c0_i32_0 : i32, i32, i32
  }
}

</mosaic_0001>

<bundles_post_ra>
// kernel: tpu_custom_call.1
= control target key start
LH: loop header
LB: loop body
LE: loop exit
PB: predicated region body
PF: predicated region fallthrough
CT: control target
= control target key end

     0   :  { %vm106_vm0 = vcmask 261120   ;;  %v1472_v7 = vmov 0   ;;  %s1926_s0 = inlined_call_operand.vmem [shape: f32[256,32], index: 0, kind: input, shape index: {}]   ;;  %s1927_s1 = inlined_call_operand.vmem [shape: f32[64,32], index: 1, kind: input, shape index: {}]   ;;  %s1928_s2 = inlined_call_operand.vmem [shape: f32[2,64,64], index: 2, kind: input, shape index: {}]   ;;  %s1929_s3 = inlined_call_operand.vmem [shape: f32[5,64,1], index: 3, kind: input, shape index: {}]   ;;  %s1930_s4 = inlined_call_operand.hbm [shape: f32[1,1,256], index: 4, kind: output, shape index: {}]  }
   0x1   :  { %v34_v0 = vld [vmem:[%s1926_s0 + $0x80] sm:$0xff]  ;;  %v35_v1 = vld [vmem:[%s1926_s0 + $0x88] sm:$0xff]  ;;  %vm1512_vm1 = vmpackc.low %vm106_vm0, %vm106_vm0  ;;  %1342 = vset.pattern.permute.xlu0 %v1472_v7  ;;  %1343 = vset.pattern.permute.xlu1 %v1472_v7 }
   0x2   :  { %v18_v2 = vld [vmem:[%s1926_s0] sm:$0xff]  ;;  %v1258_v3 = vpack.c.bf16 %v35_v1, %v34_v0  ;;  %v19_v5 = vld [vmem:[%s1926_s0 + $0x8] sm:$0xff]  ;;  %v36_v6 = vld [vmem:[%s1926_s0 + $0x90] sm:$0xff] }
   0x3   :  { %v1261_v8 = vpack.c.bf16 %v19_v5, %v18_v2  ;;  %v37_v9 = vld [vmem:[%s1926_s0 + $0x98] sm:$0xff]  ;;  %v20_v11 = vld [vmem:[%s1926_s0 + $0x10] sm:$0xff]  ;;  %v38_v13 = vld [vmem:[%s1926_s0 + $0xa0] sm:$0xff] }
   0x4   :  { %1260 = vmatprep.subr.msk.bf16.mxu0 %vm1512_vm1, %v1258_v3  ;;  %v1264_v10 = vpack.c.bf16 %v37_v9, %v36_v6  ;;  %v21_v12 = vld [vmem:[%s1926_s0 + $0x18] sm:$0xff]  ;;  %v39_v14 = vld [vmem:[%s1926_s0 + $0xa8] sm:$0xff]  ;;  %v1546_v17 = vld [vmem:[%s1927_s1] sm:$0xff] }
   0x5   :  { %1263 = vmatpush3.bf16.xpose.msk.msra.mxu0 %vm1512_vm1, %v1261_v8  ;;  %v1267_v15 = vpack.c.bf16 %v21_v12, %v20_v11  ;;  %v1270_v16 = vpack.c.bf16 %v39_v14, %v38_v13  ;;  %1242 = vmatprep.mubr.msk.f32.mxu0 %vm106_vm0, %v1546_v17  ;;  %v22_v18 = vld [vmem:[%s1926_s0 + $0x20] sm:$0xff]  ;;  %v23_v19 = vld [vmem:[%s1926_s0 + $0x28] sm:$0xff]  ;;  %v40_v21 = vld [vmem:[%s1926_s0 + $0xb0] sm:$0xff] }
   0x6   :  { %1266 = vmatprep.subr.msk.bf16.mxu0 %vm1512_vm1, %v1264_v10  ;;  %v58_v20 = vld [vmem:[%s1929_s3] sm:$0xff]  ;;  %v41_v22 = vld [vmem:[%s1926_s0 + $0xb8] sm:$0xff]  ;;  %v60_v23 = vld [vmem:[%s1929_s3 + $0x10] sm:$0xff]  ;;  %v1273_v25 = vpack.c.bf16 %v23_v19, %v22_v18 }
   0x7   :  { %68 = vperm.xlu0 %1342, %v58_v20   ;;  %v59_v24 = vld [vmem:[%s1929_s3 + $0x8] sm:$0xff]  ;;  %78 = vperm.xlu1 %1343, %v60_v23   ;;  %v61_v26 = vld [vmem:[%s1929_s3 + $0x18] sm:$0xff]  ;;  %v1276_v27 = vpack.c.bf16 %v41_v22, %v40_v21  ;;  %v62_v28 = vld [vmem:[%s1929_s3 + $0x20] sm:$0xff] }
   0x8   :  { %v63_v29 = vld [vmem:[%s1929_s3 + $0x28] sm:$0xff]  ;;  %v24_v30 = vld [vmem:[%s1926_s0 + $0x30] sm:$0xff]  ;;  %v25_v31 = vld [vmem:[%s1926_s0 + $0x38] sm:$0xff] }
   0x9   :  { %v42_v32 = vld [vmem:[%s1926_s0 + $0xc0] sm:$0xff]  ;;  %v43_v33 = vld [vmem:[%s1926_s0 + $0xc8] sm:$0xff]  ;;  %v64_v34 = vld [vmem:[%s1929_s3 + $0x30] sm:$0xff]  ;;  %v1279_v35 = vpack.c.bf16 %v25_v31, %v24_v30 }
   0xa   :  { %v65_v36 = vld [vmem:[%s1929_s3 + $0x38] sm:$0xff] }
   0xb   :  { %73 = vperm.xlu0 %1342, %v59_v24   ;;  %83 = vperm.xlu1 %1343, %v61_v26  }
   0xd   :  { %1269 = vmatpush3.bf16.xpose.msk.msra.mxu0 %vm1512_vm1, %v1267_v15 }
   0xe   :  { %1272 = vmatprep.subr.msk.bf16.mxu0 %vm1512_vm1, %v1270_v16 }
   0xf   :  { %88 = vperm.xlu0 %1342, %v62_v28   ;;  %93 = vperm.xlu1 %1343, %v63_v29  }
  0x15   :  { %1275 = vmatpush3.bf16.xpose.msk.msra.mxu0 %vm1512_vm1, %v1273_v25 }
  0x16   :  { %1278 = vmatprep.subr.msk.bf16.mxu0 %vm1512_vm1, %v1276_v27 }
  0x17   :  { %9 = vsyncpa [#allocation3], 0  ;;  %v1282_v37 = vpack.c.bf16 %v43_v33, %v42_v32  ;;  %98 = vperm.xlu0 %1342, %v64_v34   ;;  %v1159_v38 = vld [vmem:[%s1929_s3 + $0x40] sm:$0xff]  ;;  %103 = vperm.xlu1 %1343, %v65_v36   ;;  %v1160_v39 = vld [vmem:[%s1929_s3 + $0x48] sm:$0xff]  ;;  %v1473_v27 = vmov 0.0   ;;  %vm477_vm2 = vcmask 523264  }
  0x18   :  { %v26_v40 = vld [vmem:[%s1926_s0 + $0x40] sm:$0xff]  ;;  %v27_v41 = vld [vmem:[%s1926_s0 + $0x48] sm:$0xff]  ;;  %v44_v42 = vld [vmem:[%s1926_s0 + $0xd0] sm:$0xff]  ;;  %566 = vmatprep.mubr.f32.mxu1 %v1473_v27 }
  0x19   :  { %v45_v43 = vld [vmem:[%s1926_s0 + $0xd8] sm:$0xff]  ;;  %v1161_v44 = vld [vmem:[%s1929_s3 + $0x50] sm:$0xff]  ;;  %v1285_v45 = vpack.c.bf16 %v27_v41, %v26_v40  ;;  %v1163_v48 = vld [vmem:[%s1929_s3 + $0x60] sm:$0xff] }
  0x1a   :  { %v1162_v46 = vld [vmem:[%s1929_s3 + $0x58] sm:$0xff]  ;;  %v1288_v47 = vpack.c.bf16 %v45_v43, %v44_v42  ;;  %v1164_v49 = vld [vmem:[%s1929_s3 + $0x68] sm:$0xff]  ;;  %v28_v50 = vld [vmem:[%s1926_s0 + $0x50] sm:$0xff] }
  0x1b   :  { %439 = vperm.xlu0 %1342, %v1159_v38   ;;  %444 = vperm.xlu1 %1343, %v1160_v39   ;;  %v29_v51 = vld [vmem:[%s1926_s0 + $0x58] sm:$0xff]  ;;  %v46_v52 = vld [vmem:[%s1926_s0 + $0xe0] sm:$0xff]  ;;  %v47_v53 = vld [vmem:[%s1926_s0 + $0xe8] sm:$0xff] }
  0x1c   :  { %v1165_v54 = vld [vmem:[%s1929_s3 + $0x70] sm:$0xff]  ;;  %v1291_v55 = vpack.c.bf16 %v29_v51, %v28_v50  ;;  %v1166_v56 = vld [vmem:[%s1929_s3 + $0x78] sm:$0xff]  ;;  %v1294_v57 = vpack.c.bf16 %v47_v53, %v46_v52  ;;  %v1183_v58 = vld [vmem:[%s1929_s3 + $0x80] sm:$0xff] }
  0x1d   :  { %1281 = vmatpush3.bf16.xpose.msk.msra.mxu0 %vm1512_vm1, %v1279_v35  ;;  %v1184_v59 = vld [vmem:[%s1929_s3 + $0x88] sm:$0xff]  ;;  %v30_v60 = vld [vmem:[%s1926_s0 + $0x60] sm:$0xff]  ;;  %v48_v62 = vld [vmem:[%s1926_s0 + $0xf0] sm:$0xff] }
  0x1e   :  { %1284 = vmatprep.subr.msk.bf16.mxu0 %vm1512_vm1, %v1282_v37  ;;  %v31_v61 = vld [vmem:[%s1926_s0 + $0x68] sm:$0xff]  ;;  %v49_v63 = vld [vmem:[%s1926_s0 + $0xf8] sm:$0xff]  ;;  %v1185_v0 = vld [vmem:[%s1929_s3 + $0x90] sm:$0xff] }
  0x1f   :  { %449 = vperm.xlu0 %1342, %v1161_v44   ;;  %454 = vperm.xlu1 %1343, %v1162_v46   ;;  %v1297_v1 = vpack.c.bf16 %v31_v61, %v30_v60  ;;  %v1186_v2 = vld [vmem:[%s1929_s3 + $0x98] sm:$0xff]  ;;  %v1300_v3 = vpack.c.bf16 %v49_v63, %v48_v62  ;;  %v1187_v5 = vld [vmem:[%s1929_s3 + $0xa0] sm:$0xff]  ;;  %v1188_v6 = vld [vmem:[%s1929_s3 + $0xa8] sm:$0xff] }
  0x20   :  { %v32_v7 = vld [vmem:[%s1926_s0 + $0x70] sm:$0xff]  ;;  %v33_v8 = vld [vmem:[%s1926_s0 + $0x78] sm:$0xff]  ;;  %v1199_v12 = vld [vmem:[%s1929_s3 + $0xc0] sm:$0xff] }
  0x21   :  { %v1189_v9 = vld [vmem:[%s1929_s3 + $0xb0] sm:$0xff]  ;;  %v1303_v10 = vpack.c.bf16 %v33_v8, %v32_v7  ;;  %v1190_v11 = vld [vmem:[%s1929_s3 + $0xb8] sm:$0xff]  ;;  %v1200_v13 = vld [vmem:[%s1929_s3 + $0xc8] sm:$0xff] }
  0x22   :  { %v1201_v14 = vld [vmem:[%s1929_s3 + $0xd0] sm:$0xff]  ;;  %v1202_v15 = vld [vmem:[%s1929_s3 + $0xd8] sm:$0xff]  ;;  %v51_v16 = vld [vmem:[%s1927_s1 + $0x8] sm:$0xff] }
  0x23   :  { %459 = vperm.xlu0 %1342, %v1163_v48   ;;  %464 = vperm.xlu1 %1343, %v1164_v49   ;;  %v1203_v4 = vld [vmem:[%s1929_s3 + $0xe0] sm:$0xff]  ;;  %v1204_v18 = vld [vmem:[%s1929_s3 + $0xe8] sm:$0xff]  ;;  %v52_v19 = vld [vmem:[%s1927_s1 + $0x10] sm:$0xff] }
  0x24   :  { %v1206_v20 = vld [vmem:[%s1929_s3 + $0xf8] sm:$0xff]  ;;  %v1207_v22 = vld [vmem:[%s1929_s3 + $0x100] sm:$0xff]  ;;  %v55_v24 = vld [vmem:[%s1927_s1 + $0x28] sm:$0xff] }
  0x25   :  { %1287 = vmatpush3.bf16.xpose.msk.msra.mxu0 %vm1512_vm1, %v1285_v45  ;;  %v53_v21 = vld [vmem:[%s1927_s1 + $0x18] sm:$0xff]  ;;  %v54_v23 = vld [vmem:[%s1927_s1 + $0x20] sm:$0xff]  ;;  %v56_v25 = vld [vmem:[%s1927_s1 + $0x30] sm:$0xff] }
  0x26   :  { %1290 = vmatprep.subr.msk.bf16.mxu0 %vm1512_vm1, %v1288_v47  ;;  %v57_v26 = vld [vmem:[%s1927_s1 + $0x38] sm:$0xff] }
  0x27   :  { %469 = vperm.xlu0 %1342, %v1165_v54   ;;  %474 = vperm.xlu1 %1343, %v1166_v56  }
  0x2b   :  { %715 = vperm.xlu0 %1342, %v1183_v58   ;;  %720 = vperm.xlu1 %1343, %v1184_v59  }
  0x2d   :  { %1293 = vmatpush3.bf16.xpose.msk.msra.mxu0 %vm1512_vm1, %v1291_v55 }
  0x2e   :  { %1296 = vmatprep.subr.msk.bf16.mxu0 %vm1512_vm1, %v1294_v57 }
  0x2f   :  { %725 = vperm.xlu0 %1342, %v1185_v0   ;;  %730 = vperm.xlu1 %1343, %v1186_v2  }
  0x33   :  { %735 = vperm.xlu0 %1342, %v1187_v5   ;;  %740 = vperm.xlu1 %1343, %v1188_v6  }
  0x35   :  { %1299 = vmatpush3.bf16.xpose.msk.msra.mxu0 %vm1512_vm1, %v1297_v1 }
  0x36   :  { %1302 = vmatprep.subr.msk.bf16.mxu0 %vm1512_vm1, %v1300_v3 }
  0x37   :  { %745 = vperm.xlu0 %1342, %v1189_v9   ;;  %750 = vperm.xlu1 %1343, %v1190_v11  }
  0x3b   :  { %983 = vperm.xlu0 %1342, %v1199_v12   ;;  %988 = vperm.xlu1 %1343, %v1200_v13  }
  0x3d   :  { %1305 = vmatpush3.bf16.xpose.msk.msra.mxu0 %vm1512_vm1, %v1303_v10 }
  0x3f   :  { %993 = vperm.xlu0 %1342, %v1201_v14   ;;  %998 = vperm.xlu1 %1343, %v1202_v15  }
  0x43   :  { %1003 = vperm.xlu0 %1342, %v1203_v4   ;;  %1008 = vperm.xlu1 %1343, %v1204_v18  }
  0x44   :  { %1243 = vmatmul.mubr.msk.f32.vlgmr.msra.gmra.mrb[0].mxu0 %vm106_vm0, %v1546_v17  ;;  %v1205_v17 = vld [vmem:[%s1929_s3 + $0xf0] sm:$0xff] }
  0x45   :  { %1244 = vmatprep.mubr.msk.f32.mxu0 %vm106_vm0, %v51_v16 }
  0x47   :  { %1013 = vperm.xlu0 %1342, %v1205_v17   ;;  %1018 = vperm.xlu1 %1343, %v1206_v20  }
  0x48   :  { %1245 = vmatmul.mubr.msk.f32.gmra.mrb[2].mxu0 %vm106_vm0, %v51_v16 }
  0x49   :  { %1246 = vmatprep.mubr.msk.f32.mxu0 %vm106_vm0, %v52_v19 }
  0x4b   :  { %1065 = vperm.xlu0 %1342, %v1207_v22  }
  0x4c   :  { %1247 = vmatmul.mubr.msk.f32.gmra.mrb[4].mxu0 %vm106_vm0, %v52_v19 }
  0x4d   :  { %1248 = vmatprep.mubr.msk.f32.mxu0 %vm106_vm0, %v53_v21 }
  0x50   :  { %1249 = vmatmul.mubr.msk.f32.gmra.mrb[6].mxu0 %vm106_vm0, %v53_v21 }
  0x51   :  { %1250 = vmatprep.mubr.msk.f32.mxu0 %vm106_vm0, %v54_v23 }
  0x54   :  { %1251 = vmatmul.mubr.msk.f32.gmra.mrb[8].mxu0 %vm106_vm0, %v54_v23 }
  0x55   :  { %1252 = vmatprep.mubr.msk.f32.mxu0 %vm106_vm0, %v55_v24 }
  0x58   :  { %1253 = vmatmul.mubr.msk.f32.gmra.mrb[10].mxu0 %vm106_vm0, %v55_v24 }
  0x59   :  { %1254 = vmatprep.mubr.msk.f32.mxu0 %vm106_vm0, %v56_v25 }
  0x5c   :  { %1255 = vmatmul.mubr.msk.f32.gmra.mrb[12].mxu0 %vm106_vm0, %v56_v25 }
  0x5d   :  { %1256 = vmatprep.mubr.msk.f32.mxu0 %vm106_vm0, %v57_v26 }
  0x60   :  { %1257 = vmatmul.mubr.msk.f32.gmra.mrb[14].mxu0 %vm106_vm0, %v57_v26 }
  0x86   :  { %v69_v28 = vpop.permute.xlu0 %68  ;;  %v79_v39 = vpop.permute.xlu1 %78 }
  0x8a   :  { %v74_v34 = vpop.permute.xlu0 %73  ;;  %v84_v48 = vpop.permute.xlu1 %83 }
  0x8e   :  { %v89_v57 = vpop.permute.xlu0 %88  ;;  %v94_v6 = vpop.permute.xlu1 %93 }
  0x96   :  { %v99_v23 = vpop.permute.xlu0 %98 }
 0x117   :  { %v293_v29 = vpop.f32.mrb[0].mxu0 }
 0x118   :  { %v294_v30 = vadd.f32 %v293_v29, %v69_v28  ;;  %v295_v31 = vpop.f32.mrb[1].mxu0 }
 0x119   :  { %v296_v32 = vadd.f32 %v295_v31, %v69_v28 }
 0x11a   :  { %v356_v33 = vmul.f32 0.70710677, %v294_v30  ;;  %v340_v1 = vmul.f32 0.5, %v294_v30 }
 0x11b   :  { %v357_v35 = vmul.f32 0.70710677, %v296_v32  ;;  %v299_v36 = vpop.f32.mrb[2].mxu0  ;;  %v341_v7 = vmul.f32 0.5, %v296_v32 }
 0x11c   :  { %1344 = verf.f32 %v356_v33  ;;  %v300_v37 = vadd.f32 %v299_v36, %v74_v34  ;;  %v301_v38 = vpop.f32.mrb[3].mxu0 }
 0x11d   :  { %1346 = verf.f32 %v357_v35  ;;  %v302_v40 = vadd.f32 %v301_v38, %v74_v34  ;;  %v104_v38 = vpop.permute.xlu1 %103 }
 0x11e   :  { %v358_v41 = vmul.f32 0.70710677, %v300_v37  ;;  %v342_v8 = vmul.f32 0.5, %v300_v37 }
 0x11f   :  { %v359_v42 = vmul.f32 0.70710677, %v302_v40  ;;  %v305_v43 = vpop.f32.mrb[4].mxu0  ;;  %v343_v12 = vmul.f32 0.5, %v302_v40 }
 0x120   :  { %1348 = verf.f32 %v358_v41  ;;  %v306_v44 = vadd.f32 %v305_v43, %v79_v39  ;;  %v307_v45 = vpop.f32.mrb[5].mxu0 }
 0x121   :  { %1350 = verf.f32 %v359_v42  ;;  %v1779_v46 = vadd.f32 %v307_v45, %v79_v39 }
 0x122   :  { %v360_v47 = vmul.f32 0.70710677, %v306_v44  ;;  %v344_v34 = vmul.f32 0.5, %v306_v44 }
 0x123   :  { %v361_v49 = vmul.f32 0.70710677, %v1779_v46  ;;  %v311_v50 = vpop.f32.mrb[6].mxu0  ;;  %v345_v39 = vmul.f32 0.5, %v1779_v46 }
 0x124   :  { %1352 = verf.f32 %v360_v47  ;;  %v312_v51 = vadd.f32 %v311_v50, %v84_v48  ;;  %v313_v52 = vpop.f32.mrb[7].mxu0 }
 0x125   :  { %1354 = verf.f32 %v361_v49  ;;  %v314_v53 = vadd.f32 %v313_v52, %v84_v48 }
 0x126   :  { %v1345_v54 = vpop.eup %1344  ;;  %v362_v55 = vmul.f32 0.70710677, %v312_v51  ;;  %v346_v40 = vmul.f32 0.5, %v312_v51 }
 0x127   :  { %v1347_v56 = vpop.eup %1346  ;;  %v363_v58 = vmul.f32 0.70710677, %v314_v53  ;;  %v317_v59 = vpop.f32.mrb[8].mxu0  ;;  %v388_v63 = vadd.f32 1.0, %v1345_v54  ;;  %v347_v45 = vmul.f32 0.5, %v314_v53 }
 0x128   :  { %1356 = verf.f32 %v362_v55  ;;  %v1782_v60 = vadd.f32 %v317_v59, %v89_v57  ;;  %v319_v61 = vpop.f32.mrb[9].mxu0  ;;  %v389_v3 = vadd.f32 1.0, %v1347_v56 }
 0x129   :  { %1358 = verf.f32 %v363_v58  ;;  %v1784_v62 = vadd.f32 %v319_v61, %v89_v57  ;;  %v404_v4 = vmul.f32 %v388_v63, %v340_v1 }
 0x12a   :  { %v1349_v0 = vpop.eup %1348  ;;  %v364_v2 = vmul.f32 0.70710677, %v1782_v60  ;;  %v405_v20 = vmul.f32 %v389_v3, %v341_v7  ;;  %v348_v1 = vmul.f32 0.5, %v1782_v60 }
 0x12b   :  { %v1351_v5 = vpop.eup %1350  ;;  %v365_v9 = vmul.f32 0.70710677, %v1784_v62  ;;  %v323_v10 = vpop.f32.mrb[10].mxu0  ;;  %v390_v11 = vadd.f32 1.0, %v1349_v0 }
 0x12c   :  { %1360 = verf.f32 %v364_v2  ;;  %v324_v13 = vadd.f32 %v323_v10, %v94_v6  ;;  %v325_v14 = vpop.f32.mrb[11].mxu0  ;;  %v391_v15 = vadd.f32 1.0, %v1351_v5  ;;  %v349_v5 = vmul.f32 0.5, %v1784_v62 }
 0x12d   :  { %1362 = verf.f32 %v365_v9  ;;  %v326_v16 = vadd.f32 %v325_v14, %v94_v6  ;;  %v406_v18 = vmul.f32 %v390_v11, %v342_v8 }
 0x12e   :  { %v1353_v19 = vpop.eup %1352  ;;  %v366_v17 = vmul.f32 0.70710677, %v324_v13  ;;  %v407_v21 = vmul.f32 %v391_v15, %v343_v12  ;;  %v350_v2 = vmul.f32 0.5, %v324_v13 }
 0x12f   :  { %v1355_v22 = vpop.eup %1354  ;;  %v367_v24 = vmul.f32 0.70710677, %v326_v16  ;;  %v329_v25 = vpop.f32.mrb[12].mxu0  ;;  %v1308_v26 = vpack.c.bf16 %v406_v18, %v404_v4  ;;  %v392_v31 = vadd.f32 1.0, %v1353_v19  ;;  %v351_v6 = vmul.f32 0.5, %v326_v16 }
 0x130   :  { %1364 = verf.f32 %v366_v17  ;;  %v330_v28 = vadd.f32 %v329_v25, %v99_v23  ;;  %v331_v29 = vpop.f32.mrb[13].mxu0  ;;  %v1306_v30 = vpack.c.bf16 %v407_v21, %v405_v20  ;;  %v393_v35 = vadd.f32 1.0, %v1355_v22 }
 0x131   :  { %1366 = verf.f32 %v367_v24  ;;  %v332_v32 = vadd.f32 %v331_v29, %v99_v23  ;;  %v408_v50 = vmul.f32 %v392_v31, %v344_v34  ;;  %v420_v31 = vld [vmem:[%s1928_s2] sm:$0xff] }
 0x132   :  { %v1357_v33 = vpop.eup %1356  ;;  %v368_v36 = vmul.f32 0.70710677, %v330_v28  ;;  %1307 = vmatprep.subr.bf16.mxu1 %v1306_v30  ;;  %v409_v55 = vmul.f32 %v393_v35, %v345_v39  ;;  %v352_v13 = vmul.f32 0.5, %v330_v28  ;;  %v421_v28 = vld [vmem:[%s1928_s2 + $0x8] sm:$0xff]  ;;  %v424_v34 = vld [vmem:[%s1928_s2 + $0x20] sm:$0xff] }
 0x133   :  { %v1359_v37 = vpop.eup %1358  ;;  %v394_v41 = vadd.f32 1.0, %v1357_v33  ;;  %v369_v42 = vmul.f32 0.70710677, %v332_v32  ;;  %v335_v43 = vpop.f32.mrb[14].mxu0  ;;  %1309 = vmatpush1.bf16.msra.mxu1 %v1308_v26  ;;  %v353_v62 = vmul.f32 0.5, %v332_v32  ;;  %v422_v32 = vld [vmem:[%s1928_s2 + $0x10] sm:$0xff] }
 0x134   :  { %v395_v47 = vadd.f32 1.0, %v1359_v37  ;;  %1368 = verf.f32 %v368_v36  ;;  %v336_v48 = vadd.f32 %v335_v43, %v104_v38  ;;  %v337_v49 = vpop.f32.mrb[15].mxu0  ;;  %v423_v33 = vld [vmem:[%s1928_s2 + $0x18] sm:$0xff]  ;;  %v425_v35 = vld [vmem:[%s1928_s2 + $0x28] sm:$0xff]  ;;  %v426_v36 = vld [vmem:[%s1928_s2 + $0x30] sm:$0xff] }
 0x135   :  { %v410_v52 = vmul.f32 %v394_v41, %v346_v40  ;;  %1370 = verf.f32 %v369_v42  ;;  %v338_v44 = vadd.f32 %v337_v49, %v104_v38  ;;  %v427_v37 = vld [vmem:[%s1928_s2 + $0x38] sm:$0xff]  ;;  %v440_v38 = vpop.permute.xlu0 %439 }
 0x136   :  { %v1361_v54 = vpop.eup %1360  ;;  %v411_v56 = vmul.f32 %v395_v47, %v347_v45  ;;  %v370_v57 = vmul.f32 0.70710677, %v336_v48  ;;  %v354_v20 = vmul.f32 0.5, %v336_v48  ;;  %v445_v45 = vpop.permute.xlu1 %444 }
 0x137   :  { %v1363_v58 = vpop.eup %1362  ;;  %v371_v46 = vmul.f32 0.70710677, %v338_v44  ;;  %v1312_v51 = vpack.c.bf16 %v410_v52, %v408_v50  ;;  %v396_v61 = vadd.f32 1.0, %v1361_v54  ;;  %v355_v16 = vmul.f32 0.5, %v338_v44 }
 0x138   :  { %1372 = verf.f32 %v370_v57  ;;  %v1310_v59 = vpack.c.bf16 %v411_v56, %v409_v55  ;;  %v397_v63 = vadd.f32 1.0, %v1363_v58 }
 0x139   :  { %1374 = verf.f32 %v371_v46  ;;  %v412_v8 = vmul.f32 %v396_v61, %v348_v1  ;;  %v450_v54 = vpop.permute.xlu0 %449 }
 0x13a   :  { %v1365_v53 = vpop.eup %1364  ;;  %1311 = vmatprep.subr.bf16.mxu1 %v1310_v59  ;;  %v413_v11 = vmul.f32 %v397_v63, %v349_v5  ;;  %v455_v59 = vpop.permute.xlu1 %454 }
 0x13b   :  { %v1367_v0 = vpop.eup %1366  ;;  %v398_v3 = vadd.f32 1.0, %v1365_v53  ;;  %1313 = vmatpush1.bf16.msra.mxu1 %v1312_v51 }
 0x13c   :  { %v399_v7 = vadd.f32 1.0, %v1367_v0 }
 0x13d   :  { %v414_v9 = vmul.f32 %v398_v3, %v350_v2 }
 0x13e   :  { %v1369_v10 = vpop.eup %1368  ;;  %v415_v12 = vmul.f32 %v399_v7, %v351_v6  ;;  %v460_v6 = vpop.permute.xlu0 %459 }
 0x13f   :  { %v1371_v14 = vpop.eup %1370  ;;  %v1316_v15 = vpack.c.bf16 %v414_v9, %v412_v8  ;;  %v400_v18 = vadd.f32 1.0, %v1369_v10 }
 0x140   :  { %v1314_v4 = vpack.c.bf16 %v415_v12, %v413_v11  ;;  %v401_v17 = vadd.f32 1.0, %v1371_v14 }
 0x141   :  { %v416_v23 = vmul.f32 %v400_v18, %v352_v13 }
 0x142   :  { %v1373_v19 = vpop.eup %1372  ;;  %1315 = vmatprep.subr.bf16.mxu1 %v1314_v4  ;;  %v417_v25 = vmul.f32 %v401_v17, %v353_v62  ;;  %v465_v17 = vpop.permute.xlu1 %464 }
 0x143   :  { %v1375_v60 = vpop.eup %1374  ;;  %v402_v21 = vadd.f32 1.0, %v1373_v19  ;;  %1317 = vmatpush1.bf16.msra.mxu1 %v1316_v15 }
 0x144   :  { %v403_v22 = vadd.f32 1.0, %v1375_v60 }
 0x145   :  { %v418_v24 = vmul.f32 %v402_v21, %v354_v20 }
 0x146   :  { %v419_v26 = vmul.f32 %v403_v22, %v355_v16 }
 0x147   :  { %v1320_v29 = vpack.c.bf16 %v418_v24, %v416_v23 }
 0x148   :  { %v1318_v30 = vpack.c.bf16 %v419_v26, %v417_v25 }
 0x14a   :  { %1319 = vmatprep.subr.bf16.mxu1 %v1318_v30 }
 0x14b   :  { %1321 = vmatpush1.bf16.msra.mxu1 %v1320_v29 }
 0x14e   :  { %1167 = vmatmul.mubr.msk.f32.vlgmr.msra.gmra.mrb[0].mxu1 %vm477_vm2, %v420_v31 }
 0x14f   :  { %572 = vmatprep.mubr.f32.mxu1 %v1473_v27 }
 0x152   :  { %1168 = vmatmul.mubr.msk.f32.gmra.mrb[2].mxu1 %vm477_vm2, %v421_v28 }
 0x153   :  { %578 = vmatprep.mubr.f32.mxu1 %v1473_v27 }
 0x156   :  { %1169 = vmatmul.mubr.msk.f32.gmra.mrb[4].mxu1 %vm477_vm2, %v422_v32 }
 0x157   :  { %584 = vmatprep.mubr.f32.mxu1 %v1473_v27 }
 0x15a   :  { %1170 = vmatmul.mubr.msk.f32.gmra.mrb[6].mxu1 %vm477_vm2, %v423_v33 }
 0x15b   :  { %590 = vmatprep.mubr.f32.mxu1 %v1473_v27 }
 0x15e   :  { %1171 = vmatmul.mubr.msk.f32.gmra.mrb[8].mxu1 %vm477_vm2, %v424_v34  ;;  %v470_v34 = vpop.permute.xlu0 %469 }
 0x15f   :  { %596 = vmatprep.mubr.f32.mxu1 %v1473_v27 }
 0x162   :  { %1172 = vmatmul.mubr.msk.f32.gmra.mrb[10].mxu1 %vm477_vm2, %v425_v35 }
 0x163   :  { %602 = vmatprep.mubr.f32.mxu1 %v1473_v27 }
 0x166   :  { %1173 = vmatmul.mubr.msk.f32.gmra.mrb[12].mxu1 %vm477_vm2, %v426_v36 }
 0x167   :  { %608 = vmatprep.mubr.f32.mxu1 %v1473_v27 }
 0x16a   :  { %1174 = vmatmul.mubr.msk.f32.gmra.mrb[14].mxu1 %vm477_vm2, %v427_v37 }
 0x16b   :  { %841 = vmatprep.mubr.f32.mxu1 %v1473_v27 }
 0x221   :  { %v568_v39 = vpop.f32.mrb[0].mxu1 }
 0x222   :  { %v569_v40 = vadd.f32 %v568_v39, %v440_v38  ;;  %v570_v41 = vpop.f32.mrb[1].mxu1 }
 0x223   :  { %v571_v42 = vadd.f32 %v570_v41, %v440_v38 }
 0x224   :  { %v631_v43 = vmul.f32 0.70710677, %v569_v40  ;;  %v615_v15 = vmul.f32 0.5, %v569_v40 }
 0x225   :  { %v632_v47 = vmul.f32 0.70710677, %v571_v42  ;;  %v574_v48 = vpop.f32.mrb[2].mxu1  ;;  %v616_v60 = vmul.f32 0.5, %v571_v42 }
 0x226   :  { %1376 = verf.f32 %v631_v43  ;;  %v575_v49 = vadd.f32 %v574_v48, %v445_v45  ;;  %v576_v50 = vpop.f32.mrb[3].mxu1 }
 0x227   :  { %1378 = verf.f32 %v632_v47  ;;  %v577_v52 = vadd.f32 %v576_v50, %v445_v45  ;;  %v475_v50 = vpop.permute.xlu1 %474 }
 0x228   :  { %v633_v44 = vmul.f32 0.70710677, %v575_v49  ;;  %v617_v13 = vmul.f32 0.5, %v575_v49 }
 0x229   :  { %v634_v55 = vmul.f32 0.70710677, %v577_v52  ;;  %v580_v56 = vpop.f32.mrb[4].mxu1  ;;  %v618_v16 = vmul.f32 0.5, %v577_v52 }
 0x22a   :  { %1380 = verf.f32 %v633_v44  ;;  %v581_v57 = vadd.f32 %v580_v56, %v450_v54  ;;  %v582_v58 = vpop.f32.mrb[5].mxu1 }
 0x22b   :  { %1382 = verf.f32 %v634_v55  ;;  %v1831_v46 = vadd.f32 %v582_v58, %v450_v54 }
 0x22c   :  { %v635_v51 = vmul.f32 0.70710677, %v581_v57  ;;  %v619_v45 = vmul.f32 0.5, %v581_v57 }
 0x22d   :  { %v636_v61 = vmul.f32 0.70710677, %v1831_v46  ;;  %v586_v53 = vpop.f32.mrb[6].mxu1  ;;  %v620_v52 = vmul.f32 0.5, %v1831_v46 }
 0x22e   :  { %1384 = verf.f32 %v635_v51  ;;  %v587_v63 = vadd.f32 %v586_v53, %v455_v59  ;;  %v588_v0 = vpop.f32.mrb[7].mxu1 }
 0x22f   :  { %1386 = verf.f32 %v636_v61  ;;  %v589_v1 = vadd.f32 %v588_v0, %v455_v59 }
 0x230   :  { %v1377_v2 = vpop.eup %1376  ;;  %v637_v3 = vmul.f32 0.70710677, %v587_v63  ;;  %v621_v44 = vmul.f32 0.5, %v587_v63 }
 0x231   :  { %v1379_v5 = vpop.eup %1378  ;;  %v638_v7 = vmul.f32 0.70710677, %v589_v1  ;;  %v592_v8 = vpop.f32.mrb[8].mxu1  ;;  %v663_v11 = vadd.f32 1.0, %v1377_v2  ;;  %v622_v58 = vmul.f32 0.5, %v589_v1 }
 0x232   :  { %1388 = verf.f32 %v637_v3  ;;  %v1834_v9 = vadd.f32 %v592_v8, %v460_v6  ;;  %v594_v10 = vpop.f32.mrb[9].mxu1  ;;  %v664_v4 = vadd.f32 1.0, %v1379_v5 }
 0x233   :  { %1390 = verf.f32 %v638_v7  ;;  %v1836_v12 = vadd.f32 %v594_v10, %v460_v6  ;;  %v679_v25 = vmul.f32 %v663_v11, %v615_v15 }
 0x234   :  { %v1381_v14 = vpop.eup %1380  ;;  %v639_v18 = vmul.f32 0.70710677, %v1834_v9  ;;  %v680_v31 = vmul.f32 %v664_v4, %v616_v60  ;;  %v623_v15 = vmul.f32 0.5, %v1834_v9 }
 0x235   :  { %v1383_v19 = vpop.eup %1382  ;;  %v665_v20 = vadd.f32 1.0, %v1381_v14  ;;  %v640_v21 = vmul.f32 0.70710677, %v1836_v12  ;;  %v598_v62 = vpop.f32.mrb[10].mxu1 }
 0x236   :  { %v666_v22 = vadd.f32 1.0, %v1383_v19  ;;  %1392 = verf.f32 %v639_v18  ;;  %v599_v23 = vadd.f32 %v598_v62, %v465_v17  ;;  %v600_v24 = vpop.f32.mrb[11].mxu1  ;;  %v624_v19 = vmul.f32 0.5, %v1836_v12 }
 0x237   :  { %v681_v26 = vmul.f32 %v665_v20, %v617_v13  ;;  %1394 = verf.f32 %v640_v21  ;;  %v601_v29 = vadd.f32 %v600_v24, %v465_v17 }
 0x238   :  { %v1385_v30 = vpop.eup %1384  ;;  %v682_v28 = vmul.f32 %v666_v22, %v618_v16  ;;  %v641_v32 = vmul.f32 0.70710677, %v599_v23  ;;  %v625_v4 = vmul.f32 0.5, %v599_v23 }
 0x239   :  { %v1387_v33 = vpop.eup %1386  ;;  %v1324_v35 = vpack.c.bf16 %v681_v26, %v679_v25  ;;  %v642_v36 = vmul.f32 0.70710677, %v601_v29  ;;  %v604_v37 = vpop.f32.mrb[12].mxu1  ;;  %v667_v41 = vadd.f32 1.0, %v1385_v30  ;;  %v626_v17 = vmul.f32 0.5, %v601_v29 }
 0x23a   :  { %1396 = verf.f32 %v641_v32  ;;  %v605_v38 = vadd.f32 %v604_v37, %v470_v34  ;;  %v606_v39 = vpop.f32.mrb[13].mxu1  ;;  %v1322_v40 = vpack.c.bf16 %v682_v28, %v680_v31  ;;  %v668_v47 = vadd.f32 1.0, %v1387_v33 }
 0x23b   :  { %1398 = verf.f32 %v642_v36  ;;  %v607_v42 = vadd.f32 %v606_v39, %v470_v34  ;;  %v683_v53 = vmul.f32 %v667_v41, %v619_v45  ;;  %v1175_v41 = vld [vmem:[%s1928_s2 + $0x40] sm:$0xff] }
 0x23c   :  { %v1389_v43 = vpop.eup %1388  ;;  %v643_v48 = vmul.f32 0.70710677, %v605_v38  ;;  %1323 = vmatprep.subr.bf16.mxu1 %v1322_v40  ;;  %v684_v3 = vmul.f32 %v668_v47, %v620_v52  ;;  %v627_v23 = vmul.f32 0.5, %v605_v38  ;;  %v1176_v38 = vld [vmem:[%s1928_s2 + $0x48] sm:$0xff]  ;;  %v1179_v45 = vld [vmem:[%s1928_s2 + $0x60] sm:$0xff]  ;;  %v721_v52 = vpop.permute.xlu1 %720 }
 0x23d   :  { %v1391_v49 = vpop.eup %1390  ;;  %v669_v54 = vadd.f32 1.0, %v1389_v43  ;;  %v644_v55 = vmul.f32 0.70710677, %v607_v42  ;;  %v610_v56 = vpop.f32.mrb[14].mxu1  ;;  %1325 = vmatpush1.bf16.msra.mxu1 %v1324_v35  ;;  %v628_v12 = vmul.f32 0.5, %v607_v42  ;;  %v1177_v42 = vld [vmem:[%s1928_s2 + $0x50] sm:$0xff] }
 0x23e   :  { %v670_v51 = vadd.f32 1.0, %v1391_v49  ;;  %1400 = verf.f32 %v643_v48  ;;  %v611_v59 = vadd.f32 %v610_v56, %v475_v50  ;;  %v612_v61 = vpop.f32.mrb[15].mxu1  ;;  %v1178_v43 = vld [vmem:[%s1928_s2 + $0x58] sm:$0xff]  ;;  %v1180_v47 = vld [vmem:[%s1928_s2 + $0x68] sm:$0xff]  ;;  %v1181_v48 = vld [vmem:[%s1928_s2 + $0x70] sm:$0xff] }
 0x23f   :  { %v685_v0 = vmul.f32 %v669_v54, %v621_v44  ;;  %1402 = verf.f32 %v644_v55  ;;  %v613_v57 = vadd.f32 %v612_v61, %v475_v50  ;;  %v1182_v49 = vld [vmem:[%s1928_s2 + $0x78] sm:$0xff]  ;;  %v716_v50 = vpop.permute.xlu0 %715  ;;  %s1475_s2 = smov [#allocation2]  }
 0x240   :  { %v1393_v2 = vpop.eup %1392  ;;  %v686_v5 = vmul.f32 %v670_v51, %v622_v58  ;;  %v645_v6 = vmul.f32 0.70710677, %v611_v59  ;;  %v629_v28 = vmul.f32 0.5, %v611_v59  ;;  %s1111_s30 = sshll.u32 %s1475_s2, 4  ;;  %s1112_s30 = int_to_ptr.vmem [resolvable:$true] %s1111_s30 }
 0x241   :  { %v1395_v7 = vpop.eup %1394  ;;  %v1328_v46 = vpack.c.bf16 %v685_v0, %v683_v53  ;;  %v646_v63 = vmul.f32 0.70710677, %v613_v57  ;;  %v671_v10 = vadd.f32 1.0, %v1393_v2  ;;  %v630_v29 = vmul.f32 0.5, %v613_v57  ;;  %v731_v53 = vpop.permute.xlu1 %730  ;;  %s1448_s5 = scalar_lea.vmem %s1112_s30, 32  ;;  %p1453_p1 = scmp.lt.s32.totalorder %s1112_s30, %s1112_s30 }
 0x242   :  { %1404 = verf.f32 %v645_v6  ;;  %v1326_v8 = vpack.c.bf16 %v686_v5, %v684_v3  ;;  %v672_v11 = vadd.f32 1.0, %v1395_v7  ;;  %p1449_p0 = scmp.ne.s32.totalorder %s1112_s30, %s1448_s5  ;;  %p1454_p2 = scmp.lt.s32.totalorder %s1448_s5, %s1448_s5 }
 0x243   :  { %1406 = verf.f32 %v646_v63  ;;  %v687_v13 = vmul.f32 %v671_v10, %v623_v15  ;;  %v726_v58 = vpop.permute.xlu0 %725 }
 0x244   :  { %v1397_v1 = vpop.eup %1396  ;;  %1327 = vmatprep.subr.bf16.mxu1 %v1326_v8  ;;  %v688_v62 = vmul.f32 %v672_v11, %v624_v19  ;;  %p1455_p3 = por %p1454_p2, %p1453_p1 }
 0x245   :  { %v1399_v14 = vpop.eup %1398  ;;  %v673_v18 = vadd.f32 1.0, %v1397_v1  ;;  %1329 = vmatpush1.bf16.msra.mxu1 %v1328_v46  ;;  %v741_v8 = vpop.permute.xlu1 %740 }
 0x246   :  { %v674_v60 = vadd.f32 1.0, %v1399_v14  ;;  %p1456_p4 = pnand %p1455_p3, %p1449_p0 }
 0x247   :  { %v689_v20 = vmul.f32 %v673_v18, %v625_v4  ;;  %v736_v6 = vpop.permute.xlu0 %735 }
 0x248   :  { %v1401_v21 = vpop.eup %1400  ;;  %v690_v16 = vmul.f32 %v674_v60, %v626_v17 }
 0x249   :  { %v1403_v22 = vpop.eup %1402  ;;  %v1332_v24 = vpack.c.bf16 %v689_v20, %v687_v13  ;;  %v675_v26 = vadd.f32 1.0, %v1401_v21 }
 0x24a   :  { %v1330_v25 = vpack.c.bf16 %v690_v16, %v688_v62  ;;  %v676_v31 = vadd.f32 1.0, %v1403_v22  ;;  %v1888_v62 = vpop.permute.xlu1 %750 }
 0x24b   :  { %v691_v34 = vmul.f32 %v675_v26, %v627_v23  ;;  %v746_v19 = vpop.permute.xlu0 %745 }
 0x24c   :  { %v1405_v30 = vpop.eup %1404  ;;  %1331 = vmatprep.subr.bf16.mxu1 %v1330_v25  ;;  %v692_v36 = vmul.f32 %v676_v31, %v628_v12 }
 0x24d   :  { %v1407_v9 = vpop.eup %1406  ;;  %v677_v32 = vadd.f32 1.0, %v1405_v30  ;;  %1333 = vmatpush1.bf16.msra.mxu1 %v1332_v24 }
 0x24e   :  { %v678_v33 = vadd.f32 1.0, %v1407_v9 }
 0x24f   :  { %v693_v35 = vmul.f32 %v677_v32, %v629_v28 }
 0x250   :  { %v694_v37 = vmul.f32 %v678_v33, %v630_v29 }
 0x251   :  { %v1336_v39 = vpack.c.bf16 %v693_v35, %v691_v34  ;;  %v984_v35 = vpop.permute.xlu0 %983 }
 0x252   :  { %v1334_v40 = vpack.c.bf16 %v694_v37, %v692_v36 }
 0x254   :  { %1335 = vmatprep.subr.bf16.mxu1 %v1334_v40 }
 0x255   :  { %1337 = vmatpush1.bf16.msra.mxu1 %v1336_v39 }
 0x258   :  { %1191 = vmatmul.mubr.msk.f32.vlgmr.msra.gmra.mrb[16].mxu1 %vm477_vm2, %v1175_v41 }
 0x259   :  { %847 = vmatprep.mubr.f32.mxu1 %v1473_v27 }
 0x25c   :  { %1192 = vmatmul.mubr.msk.f32.gmra.mrb[18].mxu1 %vm477_vm2, %v1176_v38 }
 0x25d   :  { %853 = vmatprep.mubr.f32.mxu1 %v1473_v27 }
 0x260   :  { %1193 = vmatmul.mubr.msk.f32.gmra.mrb[20].mxu1 %vm477_vm2, %v1177_v42 }
 0x261   :  { %859 = vmatprep.mubr.f32.mxu1 %v1473_v27 }
 0x264   :  { %1194 = vmatmul.mubr.msk.f32.gmra.mrb[22].mxu1 %vm477_vm2, %v1178_v43 }
 0x265   :  { %865 = vmatprep.mubr.f32.mxu1 %v1473_v27 }
 0x268   :  { %1195 = vmatmul.mubr.msk.f32.gmra.mrb[24].mxu1 %vm477_vm2, %v1179_v45  ;;  %v989_v45 = vpop.permute.xlu1 %988 }
 0x269   :  { %871 = vmatprep.mubr.f32.mxu1 %v1473_v27 }
 0x26c   :  { %1196 = vmatmul.mubr.msk.f32.gmra.mrb[26].mxu1 %vm477_vm2, %v1180_v47 }
 0x26d   :  { %877 = vmatprep.mubr.f32.mxu1 %v1473_v27 }
 0x270   :  { %1197 = vmatmul.mubr.msk.f32.gmra.mrb[28].mxu1 %vm477_vm2, %v1181_v48 }
 0x271   :  { %883 = vmatprep.mubr.f32.mxu1 %v1473_v27 }
 0x274   :  { %1198 = vmatmul.mubr.msk.f32.gmra.mrb[30].mxu1 %vm477_vm2, %v1182_v49 }
 0x32b   :  { %v843_v44 = vpop.f32.mrb[16].mxu1 }
 0x32c   :  { %v844_v54 = vadd.f32 %v843_v44, %v716_v50  ;;  %v845_v55 = vpop.f32.mrb[17].mxu1 }
 0x32d   :  { %v846_v56 = vadd.f32 %v845_v55, %v716_v50 }
 0x32e   :  { %v906_v51 = vmul.f32 0.70710677, %v844_v54  ;;  %v890_v16 = vmul.f32 0.5, %v844_v54 }
 0x32f   :  { %v907_v59 = vmul.f32 0.70710677, %v846_v56  ;;  %v849_v61 = vpop.f32.mrb[18].mxu1  ;;  %v891_v26 = vmul.f32 0.5, %v846_v56 }
 0x330   :  { %1408 = verf.f32 %v906_v51  ;;  %v850_v0 = vadd.f32 %v849_v61, %v721_v52  ;;  %v851_v27 = vpop.f32.mrb[19].mxu1 }
 0x331   :  { %1410 = verf.f32 %v907_v59  ;;  %v852_v57 = vadd.f32 %v851_v27, %v721_v52 }
 0x332   :  { %v908_v2 = vmul.f32 0.70710677, %v850_v0  ;;  %v892_v12 = vmul.f32 0.5, %v850_v0 }
 0x333   :  { %v909_v3 = vmul.f32 0.70710677, %v852_v57  ;;  %v855_v5 = vpop.f32.mrb[20].mxu1  ;;  %v893_v36 = vmul.f32 0.5, %v852_v57 }
 0x334   :  { %1412 = verf.f32 %v908_v2  ;;  %v856_v7 = vadd.f32 %v855_v5, %v726_v58  ;;  %v857_v46 = vpop.f32.mrb[21].mxu1 }
 0x335   :  { %1414 = verf.f32 %v909_v3  ;;  %v858_v63 = vadd.f32 %v857_v46, %v726_v58  ;;  %v994_v3 = vpop.permute.xlu0 %993 }
 0x336   :  { %v910_v10 = vmul.f32 0.70710677, %v856_v7  ;;  %v894_v38 = vmul.f32 0.5, %v856_v7 }
 0x337   :  { %v911_v1 = vmul.f32 0.70710677, %v858_v63  ;;  %v861_v11 = vpop.f32.mrb[22].mxu1  ;;  %v895_v49 = vmul.f32 0.5, %v858_v63 }
 0x338   :  { %1416 = verf.f32 %v910_v10  ;;  %v1882_v14 = vadd.f32 %v861_v11, %v731_v53  ;;  %v863_v15 = vpop.f32.mrb[23].mxu1 }
 0x339   :  { %1418 = verf.f32 %v911_v1  ;;  %v1884_v4 = vadd.f32 %v863_v15, %v731_v53 }
 0x33a   :  { %v1409_v18 = vpop.eup %1408  ;;  %v912_v17 = vmul.f32 0.70710677, %v1882_v14  ;;  %v896_v7 = vmul.f32 0.5, %v1882_v14 }
 0x33b   :  { %v1411_v60 = vpop.eup %1410  ;;  %v938_v13 = vadd.f32 1.0, %v1409_v18  ;;  %v913_v20 = vmul.f32 0.70710677, %v1884_v4  ;;  %v867_v21 = vpop.f32.mrb[24].mxu1  ;;  %v897_v1 = vmul.f32 0.5, %v1884_v4 }
 0x33c   :  { %v939_v22 = vadd.f32 1.0, %v1411_v60  ;;  %1420 = verf.f32 %v912_v17  ;;  %v1890_v24 = vadd.f32 %v867_v21, %v736_v6  ;;  %v869_v25 = vpop.f32.mrb[25].mxu1 }
 0x33d   :  { %1422 = verf.f32 %v913_v20  ;;  %v1892_v30 = vadd.f32 %v869_v25, %v736_v6  ;;  %v954_v9 = vmul.f32 %v938_v13, %v890_v16  ;;  %v999_v16 = vpop.permute.xlu1 %998 }
 0x33e   :  { %v1413_v31 = vpop.eup %1412  ;;  %v914_v23 = vmul.f32 0.70710677, %v1890_v24  ;;  %v955_v32 = vmul.f32 %v939_v22, %v891_v26 }
 0x33f   :  { %v1415_v28 = vpop.eup %1414  ;;  %v940_v29 = vadd.f32 1.0, %v1413_v31  ;;  %v915_v33 = vmul.f32 0.70710677, %v1892_v30  ;;  %v873_v34 = vpop.f32.mrb[26].mxu1  ;;  %v1021_v47 = vmul.f32 %v984_v35, %v954_v9  ;;  %v898_v9 = vmul.f32 0.5, %v1890_v24 }
 0x340   :  { %v941_v37 = vadd.f32 1.0, %v1415_v28  ;;  %1424 = verf.f32 %v914_v23  ;;  %v1896_v39 = vadd.f32 %v873_v34, %v741_v8  ;;  %v875_v40 = vpop.f32.mrb[27].mxu1  ;;  %v1022_v44 = vmul.f32 %v984_v35, %v955_v32  ;;  %v1004_v35 = vpop.permute.xlu0 %1003 }
 0x341   :  { %v956_v41 = vmul.f32 %v940_v29, %v892_v12  ;;  %1426 = verf.f32 %v915_v33  ;;  %v1898_v42 = vadd.f32 %v875_v40, %v741_v8  ;;  %v899_v12 = vmul.f32 0.5, %v1892_v30 }
 0x342   :  { %v1417_v43 = vpop.eup %1416  ;;  %v957_v48 = vmul.f32 %v941_v37, %v893_v36  ;;  %v916_v50 = vmul.f32 0.70710677, %v1896_v39 }
 0x343   :  { %v1419_v52 = vpop.eup %1418  ;;  %v1023_v54 = vmul.f32 %v989_v45, %v956_v41  ;;  %v942_v55 = vadd.f32 1.0, %v1417_v43  ;;  %v917_v56 = vmul.f32 0.70710677, %v1898_v42  ;;  %v879_v58 = vpop.f32.mrb[28].mxu1 }
 0x344   :  { %v1024_v51 = vmul.f32 %v989_v45, %v957_v48  ;;  %v943_v59 = vadd.f32 1.0, %v1419_v52  ;;  %1428 = verf.f32 %v916_v50  ;;  %v1902_v61 = vadd.f32 %v879_v58, %v746_v19  ;;  %v881_v53 = vpop.f32.mrb[29].mxu1  ;;  %v1009_v50 = vpop.permute.xlu1 %1008 }
 0x345   :  { %v1037_v0 = vadd.f32 %v1023_v54, %v1021_v47  ;;  %v958_v27 = vmul.f32 %v942_v55, %v894_v38  ;;  %1430 = verf.f32 %v917_v56  ;;  %v882_v57 = vadd.f32 %v881_v53, %v746_v19 }
 0x346   :  { %v1421_v2 = vpop.eup %1420  ;;  %v1050_v5 = vadd.f32 %v1024_v51, %v1022_v44  ;;  %v959_v6 = vmul.f32 %v943_v59, %v895_v49  ;;  %v918_v46 = vmul.f32 0.70710677, %v1902_v61  ;;  %v900_v38 = vmul.f32 0.5, %v1896_v39 }
 0x347   :  { %v1423_v63 = vpop.eup %1422  ;;  %v1025_v8 = vmul.f32 %v994_v3, %v958_v27  ;;  %v944_v10 = vadd.f32 1.0, %v1421_v2  ;;  %v919_v11 = vmul.f32 0.70710677, %v882_v57  ;;  %v885_v15 = vpop.f32.mrb[30].mxu1  ;;  %v901_v45 = vmul.f32 0.5, %v1898_v42 }
 0x348   :  { %v1026_v18 = vmul.f32 %v994_v3, %v959_v6  ;;  %v945_v17 = vadd.f32 1.0, %v1423_v63  ;;  %1432 = verf.f32 %v918_v46  ;;  %v886_v19 = vadd.f32 %v885_v15, %v1888_v62  ;;  %v887_v60 = vpop.f32.mrb[31].mxu1  ;;  %v1014_v2 = vpop.permute.xlu0 %1013 }
 0x349   :  { %v1038_v13 = vadd.f32 %v1037_v0, %v1025_v8  ;;  %v960_v20 = vmul.f32 %v944_v10, %v896_v7  ;;  %1434 = verf.f32 %v919_v11  ;;  %v888_v14 = vadd.f32 %v887_v60, %v1888_v62 }
 0x34a   :  { %v1425_v21 = vpop.eup %1424  ;;  %v1051_v22 = vadd.f32 %v1050_v5, %v1026_v18  ;;  %v961_v25 = vmul.f32 %v945_v17, %v897_v1  ;;  %v920_v26 = vmul.f32 0.70710677, %v886_v19  ;;  %v902_v56 = vmul.f32 0.5, %v1902_v61  ;;  %v1019_v61 = vpop.permute.xlu1 %1018 }
 0x34b   :  { %v1427_v31 = vpop.eup %1426  ;;  %v1027_v4 = vmul.f32 %v999_v16, %v960_v20  ;;  %v946_v23 = vadd.f32 1.0, %v1425_v21  ;;  %v921_v28 = vmul.f32 0.70710677, %v888_v14  ;;  %v903_v59 = vmul.f32 0.5, %v882_v57 }
 0x34c   :  { %v1028_v32 = vmul.f32 %v999_v16, %v961_v25  ;;  %v947_v29 = vadd.f32 1.0, %v1427_v31  ;;  %1436 = verf.f32 %v920_v26  ;;  %v904_v7 = vmul.f32 0.5, %v886_v19 }
 0x34d   :  { %v1039_v33 = vadd.f32 %v1038_v13, %v1027_v4  ;;  %v962_v34 = vmul.f32 %v946_v23, %v898_v9  ;;  %1438 = verf.f32 %v921_v28  ;;  %v905_v8 = vmul.f32 0.5, %v888_v14  ;;  %v1066_v23 = vpop.permute.xlu0 %1065 }
 0x34e   :  { %v1429_v62 = vpop.eup %1428  ;;  %v1052_v36 = vadd.f32 %v1051_v22, %v1028_v32  ;;  %v963_v37 = vmul.f32 %v947_v29, %v899_v12 }
 0x34f   :  { %v1431_v40 = vpop.eup %1430  ;;  %v1029_v41 = vmul.f32 %v1004_v35, %v962_v34  ;;  %v948_v43 = vadd.f32 1.0, %v1429_v62 }
 0x350   :  { %v1030_v24 = vmul.f32 %v1004_v35, %v963_v37  ;;  %v949_v47 = vadd.f32 1.0, %v1431_v40  ;;  %v1474_v37 = vmov 1966171168  }
 0x351   :  { %v1040_v48 = vadd.f32 %v1039_v33, %v1029_v41  ;;  %v964_v30 = vmul.f32 %v948_v43, %v900_v38  ;;  %v1086_v40 = vunpack.c.l.s4 %v1474_v37  ;;  %v1088_v41 = vlaneseq }
 0x352   :  { %v1433_v49 = vpop.eup %1432  ;;  %v1053_v52 = vadd.f32 %v1052_v36, %v1030_v24  ;;  %v965_v44 = vmul.f32 %v949_v47, %v901_v45 }
 0x353   :  { %v1435_v54 = vpop.eup %1434  ;;  %v1031_v55 = vmul.f32 %v1009_v50, %v964_v30  ;;  %v950_v58 = vadd.f32 1.0, %v1433_v49  ;;  %v1087_v38 = vunpack.c.0.s8 %v1086_v40  ;;  %v1089_v43 = vshrl.u32 %v1088_v41, 7 }
 0x354   :  { %v1032_v51 = vmul.f32 %v1009_v50, %v965_v44  ;;  %v951_v53 = vadd.f32 1.0, %v1435_v54  ;;  %vm1102_vm3 = vcmp.lt.s32.totalorder %v1088_v41, 256 }
 0x355   :  { %v1041_v39 = vadd.f32 %v1040_v48, %v1031_v55  ;;  %v966_v0 = vmul.f32 %v950_v58, %v902_v56  ;;  %v1090_v45 = vsub.s32 %v1087_v38, %v1089_v43 }
 0x356   :  { %v1437_v27 = vpop.eup %1436  ;;  %v1054_v42 = vadd.f32 %v1053_v52, %v1032_v51  ;;  %v967_v3 = vmul.f32 %v951_v53, %v903_v59 }
 0x357   :  { %v1439_v5 = vpop.eup %1438  ;;  %v1033_v6 = vmul.f32 %v1014_v2, %v966_v0  ;;  %v952_v46 = vadd.f32 1.0, %v1437_v27 }
 0x358   :  { %v1034_v63 = vmul.f32 %v1014_v2, %v967_v3  ;;  %v953_v10 = vadd.f32 1.0, %v1439_v5 }
 0x359   :  { %v1042_v1 = vadd.f32 %v1041_v39, %v1033_v6  ;;  %v968_v11 = vmul.f32 %v952_v46, %v904_v7 }
 0x35a   :  { %v1055_v15 = vadd.f32 %v1054_v42, %v1034_v63  ;;  %v969_v18 = vmul.f32 %v953_v10, %v905_v8 }
 0x35b   :  { %v1035_v57 = vmul.f32 %v1019_v61, %v968_v11 }
 0x35c   :  { %v1036_v17 = vmul.f32 %v1019_v61, %v969_v18 }
 0x35d   :  { %v1043_v60 = vadd.f32 %v1042_v1, %v1035_v57 }
 0x35e   :  { %v1056_v13 = vadd.f32 %v1055_v15, %v1036_v17 }
 0x35f   :  { %v1044_v20 = vrot.slane %v1043_v60, 4 }
 0x360   :  { %v1057_v21 = vrot.slane %v1056_v13, 4 }
 0x361   :  { %v1045_v16 = vadd.f32 %v1044_v20, %v1043_v60 }
 0x362   :  { %v1058_v22 = vadd.f32 %v1057_v21, %v1056_v13 }
 0x363   :  { %v1046_v25 = vrot.slane %v1045_v16, 2 }
 0x364   :  { %v1059_v26 = vrot.slane %v1058_v22, 2 }
 0x365   :  { %v1047_v19 = vadd.f32 %v1046_v25, %v1045_v16 }
 0x366   :  { %v1060_v31 = vadd.f32 %v1059_v26, %v1058_v22 }
 0x367   :  { %v1048_v4 = vrot.slane %v1047_v19, 1 }
 0x368   :  { %v1061_v14 = vrot.slane %v1060_v31, 1 }
 0x369   :  { %v1049_v9 = vadd.f32 %v1048_v4, %v1047_v19 }
 0x36a   :  { %v1062_v28 = vadd.f32 %v1061_v14, %v1060_v31 }
 0x36b   :  { %v1068_v32 = vadd.f32 %v1066_v23, %v1049_v9 }
 0x36c   :  { %v1069_v12 = vadd.f32 %v1066_v23, %v1062_v28 }
 0x36d   :  { %v1208_v29 = vmul.f32 -1.442695, %v1068_v32 }
 0x36e   :  { %v1209_v33 = vmul.f32 -1.442695, %v1069_v12 }
 0x36f   :  { %1440 = vpow2.f32 %v1208_v29 }
 0x370   :  { %1442 = vpow2.f32 %v1209_v33 }
 0x379   :  { %v1441_v34 = vpop.eup %1440 }
 0x37a   :  { %v1443_v62 = vpop.eup %1442  ;;  %v1076_v35 = vadd.f32 1.0, %v1441_v34 }
 0x37b   :  { %v1077_v36 = vadd.f32 1.0, %v1443_v62 }
 0x37c   :  { %1444 = vrcp.f32 %v1076_v35 }
 0x37d   :  { %1446 = vrcp.f32 %v1077_v36 }
 0x386   :  { %v1445_v24 = vpop.eup %1444 }
 0x387   :  { %v1447_v47 = vpop.eup %1446 }
 0x388   :  { %v1084_v48 = vcombine.low %v1445_v24, %v1447_v47 }
 0x38a   :  { %v1091_v30 = vrot.slane %v1084_v48, %v1090_v45 }
 0x38c   :  { %v1098_v49 = vrot.slane %v1091_v30, %v1090_v45 }
 0x38e   :  { %1104 = vst.msk [vmem:[#allocation2] sm:$0x3] %vm1102_vm3, %v1098_v49 }
 0x38f   :  { %1459 = shalt.err (!%p1456_p4)
}
 0x390   :  { %s1460_s8 = scalar_lea.hbm %s1930_s4, 32 }
 0x391   :  { %p1461_p5 = scmp.ne.s32.totalorder %s1930_s4, %s1460_s8  ;;  %p1464_p6 = scmp.lt.u32.totalorder %s1460_s8, %s1930_s4 }
 0x393   :  { %p1466_p7 = pnand %p1464_p6, %p1461_p5 }
 0x395   :  { %1469 = shalt.err (!%p1466_p7)
}
 0x396   :  { %1114 = dma.vmem_to_hbm [thread:$0]  %s1112_s30, 32, %s1930_s4, [#allocation3]  }
 0x397   :  { %1470 = dma.done.wait [#allocation3], 32  }
 0x398   :  { %1471 = vsyncadd [#allocation3], 4294967264 }
 0x399   :  { %1118 = vsyncpa [#allocation3], 1 }

</bundles_post_ra>
